<compile_context>
chip_gen: v6e
topology: v6e:2x2x1
jax: 0.10.0
libtpu: 0.0.40
codegen_flags: <defaults>
</compile_context>

<pallas_src>
import functools
import math

import numpy as np
import jax
import jax.numpy as jnp
from jax.experimental import pallas as pl
from jax.experimental.pallas import tpu as pltpu


# ----------------------------------------------------------------------------
# Static (numpy) sampling matrices: fold pad / stride / crop / reflect into
# 0/1 matrices so conv and deconv become dense matmuls on flattened features.
# ----------------------------------------------------------------------------
def _enc_sampling(n, k, s):
    """R[i, a, h] = 1 iff SAME-padded row a*s+i reads un-padded input row h.

    Encodes Conv2dSamePad (TF 'SAME' zero padding) + stride-s sampling along
    one spatial axis.  Returns (R, out_size)."""
    out = int(math.ceil(float(n) / float(s)))
    pad = max((out - 1) * s + k - n, 0)
    pt = pad // 2
    r = np.zeros((k, out, n), np.float32)
    for i in range(k):
        for a in range(out):
            h = a * s + i - pt
            if 0 <= h < n:
                r[i, a, h] = 1.0
    return r, out


def _dec_sampling(n, k, s):
    """RT[i, a, h] = 1 iff cropped ConvTranspose2d output row a takes tap i of
    input row h (a + crop_top == h*s + i).  Encodes ConvTranspose2d(stride s,
    no output_padding) followed by the ConvTranspose2dSamePad crop, with the
    zero-dilation folded into the index math (no dilated tensor)."""
    crop = k - s
    ct = crop // 2
    out = (n - 1) * s + k - crop              # == n * s
    r = np.zeros((k, out, n), np.float32)
    for i in range(k):
        for a in range(out):
            num = a + ct - i
            if num >= 0 and num % s == 0:
                h = num // s
                if 0 <= h < n:
                    r[i, a, h] = 1.0
    return r, out


def _reflect_index(n, p):
    idx = np.abs(np.arange(-p, n + p))
    return (n - 1) - np.abs((n - 1) - idx)


def _reflect_matrix(c, hi, wi, p):
    """(c*hi*wi, c*(hi+2p)*(wi+2p)) 0/1 matrix implementing ReflectionPad2d(p)."""
    ho, wo = hi + 2 * p, wi + 2 * p
    rh = np.zeros((ho, hi), np.float32)
    rh[np.arange(ho), _reflect_index(hi, p)] = 1.0
    rw = np.zeros((wo, wi), np.float32)
    rw[np.arange(wo), _reflect_index(wi, p)] = 1.0
    g = np.einsum('ah,bw->hwab', rh, rw).reshape(hi * wi, ho * wo)
    g = np.kron(np.eye(c, dtype=np.float32), g)
    return jnp.asarray(g)


# ----------------------------------------------------------------------------
# Fused forward kernel: a static chain of lane-dense matmuls, all in VMEM.
#   step kinds:  'right'  h <- [relu](h @ K [+ bias])   (conv / deconv / pad)
#                'left'   h <- C @ h                    (self expression)
# ----------------------------------------------------------------------------
def _make_fused_kernel(step_meta, z_step, zr_step, compute_dtype):
    def kernel(*refs):
        op_refs = refs[1:-3]
        z_out, zr_out, xr_out = refs[-3], refs[-2], refs[-1]
        h = refs[0][...]
        ri = 0
        for si, (kind, has_bias, relu) in enumerate(step_meta):
            m = op_refs[ri][...]
            ri += 1
            if kind == 'left':
                h = jnp.dot(m, h.astype(compute_dtype),
                            preferred_element_type=jnp.float32)
            else:
                h = jnp.dot(h.astype(compute_dtype), m,
                            preferred_element_type=jnp.float32)
                if has_bias:
                    h = h + op_refs[ri][...]
                    ri += 1
                if relu:
                    h = jnp.maximum(h, 0.0)
            if si == z_step:
                z_out[...] = h.astype(z_out.dtype)
            if si == zr_step:
                zr_out[...] = h.astype(zr_out.dtype)
        xr_out[...] = h.astype(xr_out.dtype)
    return kernel


def _fused_forward_call(x_flat, steps, z_step, zr_step, z_dim, xr_dim,
                        compute_dtype):
    n = x_flat.shape[0]
    operands = []
    meta = []
    for kind, mat, bias, relu in steps:
        operands.append(mat.astype(compute_dtype))
        if kind == 'left':
            meta.append(('left', False, False))
        else:
            has_bias = bias is not None
            if has_bias:
                operands.append(bias.astype(jnp.float32))
            meta.append(('right', has_bias, relu))

    kernel = _make_fused_kernel(tuple(meta), z_step, zr_step, compute_dtype)
    vmem = lambda: pl.BlockSpec(memory_space=pltpu.MemorySpace.VMEM)
    out_shape = (jax.ShapeDtypeStruct((n, z_dim), jnp.float32),
                 jax.ShapeDtypeStruct((n, z_dim), jnp.float32),
                 jax.ShapeDtypeStruct((n, xr_dim), jnp.float32))
    # Single launch, no grid: every operand (<1 MiB total at DSCNet sizes)
    # lives in VMEM with a single buffer.
    # TODO(synk): if num_sample is scaled to real DSCNet datasets (400..5000),
    # tile the self-expression matmul over (M, K) with a "parallel" grid axis
    # (fits v7x's 64 MiB VMEM, uses both TensorCores).
    return pl.pallas_call(
        kernel,
        out_shape=out_shape,
        in_specs=[vmem() for _ in range(1 + len(operands))],
        out_specs=(vmem(), vmem(), vmem()),
    )(x_flat.astype(compute_dtype), *operands)


# ----------------------------------------------------------------------------
# DSCNet parameters + forward
# ----------------------------------------------------------------------------
def init_dscnet_params(key, channels, kernels, num_sample):
    params = {"enc": [], "dec": []}
    n_layers = len(channels) - 1
    keys = jax.random.split(key, 4 * n_layers)
    # encoder convs: Conv2d(channels[i-1] -> channels[i], k, stride=2)
    for i in range(1, len(channels)):
        k = kernels[i - 1]
        cin, cout = channels[i - 1], channels[i]
        fan_in = cin * k * k
        w = jax.random.normal(keys[2 * (i - 1)], (cout, cin, k, k), jnp.float32)
        w = w * jnp.sqrt(2.0 / fan_in)
        bound = 1.0 / math.sqrt(fan_in)
        b = jax.random.uniform(keys[2 * (i - 1) + 1], (cout,), jnp.float32,
                               -bound, bound)
        params["enc"].append({"w": w, "b": b})
    # decoder deconvs: ConvTranspose2d(rev_ch[i] -> rev_ch[i+1], k, stride=2)
    rch = list(reversed(channels))
    rk = list(reversed(kernels))
    for i in range(len(rch) - 1):
        k = rk[i]
        cin, cout = rch[i], rch[i + 1]
        fan_in = cin * k * k
        w = jax.random.normal(keys[2 * n_layers + 2 * i], (cin, cout, k, k),
                              jnp.float32)
        w = w * jnp.sqrt(2.0 / fan_in)
        bound = 1.0 / math.sqrt(fan_in)
        b = jax.random.uniform(keys[2 * n_layers + 2 * i + 1], (cout,),
                               jnp.float32, -bound, bound)
        params["dec"].append({"w": w, "b": b})
    # self-expression coefficient: 1e-8 * ones(n, n)
    params["coef"] = 1e-8 * jnp.ones((num_sample, num_sample), jnp.float32)
    return params


def dscnet_forward(params, x, padding, compute_dtype=jnp.float32):
    """x: (N, C0, H, W) NCHW.  Returns (x_recon, z, z_recon) like the PyTorch model."""
    hi = jax.lax.Precision.HIGHEST
    n, c0, hh, ww = x.shape
    x_flat = x.reshape(n, c0 * hh * ww)      # NCHW flattening == torch .view(n, -1)

    steps = []
    # ----- encoder: SamePad + Conv2d(stride 2) + ReLU, folded per layer -----
    h_, w_ = hh, ww
    for layer in params["enc"]:
        wgt, b = layer["w"], layer["b"]
        cout, cin, k, _ = wgt.shape
        rr, oh = _enc_sampling(h_, k, 2)
        cc, ow = _enc_sampling(w_, k, 2)
        op = jnp.einsum("ocij,iah,jbw->chwoab", wgt,
                        jnp.asarray(rr), jnp.asarray(cc), precision=hi)
        op = op.reshape(cin * h_ * w_, cout * oh * ow)
        bias = jnp.repeat(b, oh * ow)[None, :]
        steps.append(("right", op, bias, True))
        h_, w_ = oh, ow
    z_step = len(steps) - 1
    z_dim = params["enc"][-1]["w"].shape[0] * h_ * w_

    # ----- self expression (diag=True path of the reference): Coefficient @ z -----
    steps.append(("left", params["coef"], None, False))
    zr_step = len(steps) - 1

    # ----- decoder: ConvTranspose2d(s=2) + SamePad crop + ReLU + ReflectionPad -----
    rpad = list(reversed(list(padding)))
    dec_ops = []
    for i, layer in enumerate(params["dec"]):
        wt, b = layer["w"], layer["b"]
        cin, cout, k, _ = wt.shape
        rr, oh = _dec_sampling(h_, k, 2)
        cc, ow = _dec_sampling(w_, k, 2)
        op = jnp.einsum("coij,iah,jbw->chwoab", wt,
                        jnp.asarray(rr), jnp.asarray(cc), precision=hi)
        op = op.reshape(cin * h_ * w_, cout * oh * ow)
        bias = jnp.repeat(b, oh * ow)[None, :]
        p = int(rpad[i])
        refl = _reflect_matrix(cout, oh, ow, p) if p > 0 else None
        dec_ops.append((op, bias, refl))
        h_, w_ = oh + 2 * p, ow + 2 * p
    # ReflectionPad2d is linear and sits after the ReLU -> fold it into the
    # NEXT layer's operator; a trailing pad (last layer) is its own matmul step.
    for i, (op, bias, refl) in enumerate(dec_ops):
        if i > 0 and dec_ops[i - 1][2] is not None:
            op = jnp.dot(dec_ops[i - 1][2], op, precision=hi)
        steps.append(("right", op, bias, True))
    if dec_ops[-1][2] is not None:
        steps.append(("right", dec_ops[-1][2], None, False))

    out_c = params["dec"][-1]["w"].shape[1]
    xr_dim = out_c * h_ * w_

    z, z_recon, xr_flat = _fused_forward_call(
        x_flat, steps, z_step, zr_step, z_dim, xr_dim, compute_dtype)
    x_recon = xr_flat.reshape(n, out_c, h_, w_)
    return x_recon, z, z_recon
    # TODO(synk): compute_ot / loss_fn need POT's ot.emd2 / ot.sinkhorn
    # (training-time utilities, not part of forward()) and are not implemented.


# ----------------------------------------------------------------------------
# Pure-JAX reference (direct transcription of the PyTorch module) for checking.
# ----------------------------------------------------------------------------
def _ref_forward(params, x, padding):
    hi = jax.lax.Precision.HIGHEST

    def same_pad(h, k, s):
        hh, ww = h.shape[2], h.shape[3]
        oh, ow = math.ceil(hh / s), math.ceil(ww / s)
        ph = max((oh - 1) * s + k - hh, 0)
        pw = max((ow - 1) * s + k - ww, 0)
        p_t, p_l = ph // 2, pw // 2
        return jnp.pad(h, ((0, 0), (0, 0), (p_t, ph - p_t), (p_l, pw - p_l)))

    def conv(h, w, b, s):
        cout, cin, k, _ = w.shape
        nn, _, hh, ww = h.shape
        oh, ow = (hh - k) // s + 1, (ww - k) // s + 1
        cols = []
        for i in range(k):
            for j in range(k):
                cols.append(h[:, :, i:i + s * oh:s, j:j + s * ow:s])
        patches = jnp.stack(cols, axis=2).reshape(nn, cin * k * k, oh * ow)
        w2 = w.reshape(cout, cin * k * k)
        y = jnp.einsum("ok,nkm->nom", w2, patches, precision=hi)
        return (y + b[None, :, None]).reshape(nn, cout, oh, ow)

    def deconv(h, wt, b, s):
        cin, cout, k, _ = wt.shape
        nn, _, hh, ww = h.shape
        hd, wd = (hh - 1) * s + 1, (ww - 1) * s + 1
        xd = jnp.zeros((nn, cin, hd, wd), h.dtype).at[:, :, ::s, ::s].set(h)
        xp = jnp.pad(xd, ((0, 0), (0, 0), (k - 1, k - 1), (k - 1, k - 1)))
        w2 = jnp.flip(wt, axis=(2, 3)).transpose(1, 0, 2, 3)
        return conv(xp, w2, b, 1)

    def deconv_crop(h, k, s):
        hh, ww = h.shape[2], h.shape[3]
        ph, pw = k - s, k - s
        p_t, p_l = ph // 2, pw // 2
        return h[:, :, p_t:hh - (ph - p_t), p_l:ww - (pw - p_l)]

    h = x
    for layer in params["enc"]:
        k = layer["w"].shape[-1]
        h = same_pad(h, k, 2)
        h = jax.nn.relu(conv(h, layer["w"], layer["b"], 2))
    nn = x.shape[0]
    z = h.reshape(nn, -1)
    z_recon = jnp.dot(params["coef"], z, precision=hi)
    hd = z_recon.reshape(h.shape)
    rpad = list(reversed(list(padding)))
    for i, layer in enumerate(params["dec"]):
        k = layer["w"].shape[-1]
        hd = deconv(hd, layer["w"], layer["b"], 2)
        hd = deconv_crop(hd, k, 2)
        hd = jax.nn.relu(hd)
        if rpad[i] > 0:
            p = rpad[i]
            hd = jnp.pad(hd, ((0, 0), (0, 0), (p, p), (p, p)), mode="reflect")
    return hd, z, z_recon


# ----------------------------------------------------------------------------
if __name__ == "__main__":
    # Small config consistent with DSCNet: grayscale 16x16 images, 2 conv layers.
    channels = [1, 4, 8]
    kernels = [3, 3]
    padding = [0, 0]
    num_sample = 8                  # batch == number of samples (n x n Coefficient)

    key = jax.random.PRNGKey(0)
    k_param, k_x = jax.random.split(key)
    params = init_dscnet_params(k_param, channels, kernels, num_sample)
    x = jax.random.normal(k_x, (num_sample, channels[0], 16, 16), jnp.float32)

    fwd = jax.jit(functools.partial(dscnet_forward, padding=tuple(padding)))
    x_recon, z, z_recon = fwd(params, x)
    jax.block_until_ready((x_recon, z, z_recon))

    assert x_recon.shape == x.shape, x_recon.shape
    assert z.shape == (num_sample, channels[-1] * 4 * 4), z.shape
    assert z_recon.shape == z.shape, z_recon.shape
    assert bool(jnp.all(jnp.isfinite(x_recon)))

    # Cross-check against a pure-JAX transcription of the PyTorch module.
    x_recon_ref, z_ref, z_recon_ref = _ref_forward(params, x, tuple(padding))
    for name, got, want in (("z", z, z_ref),
                            ("z_recon", z_recon, z_recon_ref),
                            ("x_recon", x_recon, x_recon_ref)):
        err = float(jnp.max(jnp.abs(got - want)))
        assert err < 5e-2, (name, err)

    print("KERNEL_OK")
</pallas_src>

<mosaic_0001>
module attributes {stable_mosaic.version = 11 : i64} {
  func.func @kernel(%arg0: memref<8x256xf32, #tpu.memory_space<vmem>>, %arg1: memref<256x256xf32, #tpu.memory_space<vmem>>, %arg2: memref<1x256xf32, #tpu.memory_space<vmem>>, %arg3: memref<256x128xf32, #tpu.memory_space<vmem>>, %arg4: memref<1x128xf32, #tpu.memory_space<vmem>>, %arg5: memref<8x8xf32, #tpu.memory_space<vmem>>, %arg6: memref<128x256xf32, #tpu.memory_space<vmem>>, %arg7: memref<1x256xf32, #tpu.memory_space<vmem>>, %arg8: memref<256x256xf32, #tpu.memory_space<vmem>>, %arg9: memref<1x256xf32, #tpu.memory_space<vmem>>, %arg10: memref<8x128xf32, #tpu.memory_space<vmem>>, %arg11: memref<8x128xf32, #tpu.memory_space<vmem>>, %arg12: memref<8x256xf32, #tpu.memory_space<vmem>>) attributes {dimension_semantics = [], scalar_prefetch = 0 : i64, scratch_operands = 0 : i64, tpu.core_type = #tpu.core_type<tc>} {
    %c0 = arith.constant 0 : index
    %c0_0 = arith.constant 0 : index
    %0 = vector.load %arg0[%c0, %c0_0] : memref<8x256xf32, #tpu.memory_space<vmem>>, vector<8x256xf32>
    %c0_1 = arith.constant 0 : index
    %c0_2 = arith.constant 0 : index
    %1 = vector.load %arg1[%c0_1, %c0_2] : memref<256x256xf32, #tpu.memory_space<vmem>>, vector<256x256xf32>
    %cst = arith.constant dense<0.000000e+00> : vector<8x256xf32>
    %2 = tpu.matmul %0, %1, %cst {dimension_numbers = #tpu.dot_dimension_numbers<[1], [0], [0], [1], [0, 0, 1, 1], [], []>} : vector<8x256xf32>, vector<256x256xf32>, vector<8x256xf32> -> vector<8x256xf32>
    %c0_3 = arith.constant 0 : index
    %c0_4 = arith.constant 0 : index
    %3 = vector.load %arg2[%c0_3, %c0_4] : memref<1x256xf32, #tpu.memory_space<vmem>>, vector<1x256xf32>
    %4 = vector.broadcast %3 : vector<1x256xf32> to vector<8x256xf32>
    %5 = arith.addf %2, %4 : vector<8x256xf32>
    %cst_5 = arith.constant 0.000000e+00 : f32
    %6 = vector.broadcast %cst_5 : f32 to vector<8x256xf32>
    %7 = arith.maximumf %5, %6 : vector<8x256xf32>
    %c0_6 = arith.constant 0 : index
    %c0_7 = arith.constant 0 : index
    %8 = vector.load %arg3[%c0_6, %c0_7] : memref<256x128xf32, #tpu.memory_space<vmem>>, vector<256x128xf32>
    %cst_8 = arith.constant dense<0.000000e+00> : vector<8x128xf32>
    %9 = tpu.matmul %7, %8, %cst_8 {dimension_numbers = #tpu.dot_dimension_numbers<[1], [0], [0], [1], [0, 0, 1, 1], [], []>} : vector<8x256xf32>, vector<256x128xf32>, vector<8x128xf32> -> vector<8x128xf32>
    %c0_9 = arith.constant 0 : index
    %c0_10 = arith.constant 0 : index
    %10 = vector.load %arg4[%c0_9, %c0_10] : memref<1x128xf32, #tpu.memory_space<vmem>>, vector<1x128xf32>
    %11 = vector.broadcast %10 : vector<1x128xf32> to vector<8x128xf32>
    %12 = arith.addf %9, %11 : vector<8x128xf32>
    %cst_11 = arith.constant 0.000000e+00 : f32
    %13 = vector.broadcast %cst_11 : f32 to vector<8x128xf32>
    %14 = arith.maximumf %12, %13 : vector<8x128xf32>
    %c0_12 = arith.constant 0 : index
    %c0_13 = arith.constant 0 : index
    %15 = vector.load %arg10[%c0_12, %c0_13] : memref<8x128xf32, #tpu.memory_space<vmem>>, vector<8x128xf32>
    tpu.vector_store %arg10[%c0_12, %c0_13], %14 {strides = array<i32>} : memref<8x128xf32, #tpu.memory_space<vmem>>, vector<8x128xf32>,
    %c0_14 = arith.constant 0 : index
    %c0_15 = arith.constant 0 : index
    %16 = vector.load %arg5[%c0_14, %c0_15] : memref<8x8xf32, #tpu.memory_space<vmem>>, vector<8x8xf32>
    %cst_16 = arith.constant dense<0.000000e+00> : vector<8x128xf32>
    %17 = tpu.matmul %16, %14, %cst_16 {dimension_numbers = #tpu.dot_dimension_numbers<[1], [0], [0], [1], [0, 0, 1, 1], [], []>} : vector<8x8xf32>, vector<8x128xf32>, vector<8x128xf32> -> vector<8x128xf32>
    %c0_17 = arith.constant 0 : index
    %c0_18 = arith.constant 0 : index
    %18 = vector.load %arg11[%c0_17, %c0_18] : memref<8x128xf32, #tpu.memory_space<vmem>>, vector<8x128xf32>
    tpu.vector_store %arg11[%c0_17, %c0_18], %17 {strides = array<i32>} : memref<8x128xf32, #tpu.memory_space<vmem>>, vector<8x128xf32>,
    %c0_19 = arith.constant 0 : index
    %c0_20 = arith.constant 0 : index
    %19 = vector.load %arg6[%c0_19, %c0_20] : memref<128x256xf32, #tpu.memory_space<vmem>>, vector<128x256xf32>
    %cst_21 = arith.constant dense<0.000000e+00> : vector<8x256xf32>
    %20 = tpu.matmul %17, %19, %cst_21 {dimension_numbers = #tpu.dot_dimension_numbers<[1], [0], [0], [1], [0, 0, 1, 1], [], []>} : vector<8x128xf32>, vector<128x256xf32>, vector<8x256xf32> -> vector<8x256xf32>
    %c0_22 = arith.constant 0 : index
    %c0_23 = arith.constant 0 : index
    %21 = vector.load %arg7[%c0_22, %c0_23] : memref<1x256xf32, #tpu.memory_space<vmem>>, vector<1x256xf32>
    %22 = vector.broadcast %21 : vector<1x256xf32> to vector<8x256xf32>
    %23 = arith.addf %20, %22 : vector<8x256xf32>
    %cst_24 = arith.constant 0.000000e+00 : f32
    %24 = vector.broadcast %cst_24 : f32 to vector<8x256xf32>
    %25 = arith.maximumf %23, %24 : vector<8x256xf32>
    %c0_25 = arith.constant 0 : index
    %c0_26 = arith.constant 0 : index
    %26 = vector.load %arg8[%c0_25, %c0_26] : memref<256x256xf32, #tpu.memory_space<vmem>>, vector<256x256xf32>
    %cst_27 = arith.constant dense<0.000000e+00> : vector<8x256xf32>
    %27 = tpu.matmul %25, %26, %cst_27 {dimension_numbers = #tpu.dot_dimension_numbers<[1], [0], [0], [1], [0, 0, 1, 1], [], []>} : vector<8x256xf32>, vector<256x256xf32>, vector<8x256xf32> -> vector<8x256xf32>
    %c0_28 = arith.constant 0 : index
    %c0_29 = arith.constant 0 : index
    %28 = vector.load %arg9[%c0_28, %c0_29] : memref<1x256xf32, #tpu.memory_space<vmem>>, vector<1x256xf32>
    %29 = vector.broadcast %28 : vector<1x256xf32> to vector<8x256xf32>
    %30 = arith.addf %27, %29 : vector<8x256xf32>
    %cst_30 = arith.constant 0.000000e+00 : f32
    %31 = vector.broadcast %cst_30 : f32 to vector<8x256xf32>
    %32 = arith.maximumf %30, %31 : vector<8x256xf32>
    %c0_31 = arith.constant 0 : index
    %c0_32 = arith.constant 0 : index
    %33 = vector.load %arg12[%c0_31, %c0_32] : memref<8x256xf32, #tpu.memory_space<vmem>>, vector<8x256xf32>
    tpu.vector_store %arg12[%c0_31, %c0_32], %32 {strides = array<i32>} : memref<8x256xf32, #tpu.memory_space<vmem>>, vector<8x256xf32>,
    return
  }
}

</mosaic_0001>

<bundles_post_ra>
// kernel: dscnet_forward.1
= control target key start
LH: loop header
LB: loop body
LE: loop exit
PB: predicated region body
PF: predicated region fallthrough
CT: control target
= control target key end

     0   :  { %18 = vsyncpa [#allocation3], 0  ;;  %s1458_s0 = inlined_call_operand.vmem [shape: f32[8,256], index: 0, kind: input, shape index: {}]   ;;  %s1459_s1 = inlined_call_operand.vmem [shape: f32[256,256], index: 1, kind: input, shape index: {}]   ;;  %s1460_s2 = inlined_call_operand.vmem [shape: f32[1,256], index: 2, kind: input, shape index: {}]   ;;  %s1461_s3 = inlined_call_operand.vmem [shape: f32[256,128], index: 3, kind: input, shape index: {}]   ;;  %s1462_s4 = inlined_call_operand.vmem [shape: f32[1,128], index: 4, kind: input, shape index: {}]   ;;  %s1463_s5 = inlined_call_operand.vmem [shape: f32[8,8], index: 5, kind: input, shape index: {}]   ;;  %s1464_s6 = inlined_call_operand.vmem [shape: f32[128,256], index: 6, kind: input, shape index: {}]   ;;  %s1465_s7 = inlined_call_operand.vmem [shape: f32[1,256], index: 7, kind: input, shape index: {}]   ;;  %s1466_s8 = inlined_call_operand.vmem [shape: f32[256,256], index: 8, kind: input, shape index: {}]   ;;  %s1467_s9 = inlined_call_operand.vmem [shape: f32[1,256], index: 9, kind: input, shape index: {}]   ;;  %s1468_s10 = inlined_call_operand.hbm [shape: f32[8,128], index: 10, kind: output, shape index: {0}]   ;;  %s1469_s11 = inlined_call_operand.hbm [shape: f32[8,128], index: 11, kind: output, shape index: {1}]   ;;  %s1470_s12 = inlined_call_operand.vmem [shape: f32[8,256], index: 12, kind: output, shape index: {2}]  }
   0x1   :  { %v73_v0 = vld [vmem:[%s1459_s1 + $0xf8] sm:$0xff]  ;;  %v72_v1 = vld [vmem:[%s1459_s1 + $0xf0] sm:$0xff]  ;;  %v71_v2 = vld [vmem:[%s1459_s1 + $0xe8] sm:$0xff] }
   0x2   :  { %118 = vmatprep.subr.mxu0 %v73_v0  ;;  %v70_v3 = vld [vmem:[%s1459_s1 + $0xe0] sm:$0xff]  ;;  %v69_v4 = vld [vmem:[%s1459_s1 + $0xd8] sm:$0xff]  ;;  %v68_v5 = vld [vmem:[%s1459_s1 + $0xd0] sm:$0xff] }
   0x3   :  { %119 = vmatpush1.msra.mxu0 %v72_v1  ;;  %v67_v6 = vld [vmem:[%s1459_s1 + $0xc8] sm:$0xff]  ;;  %v66_v7 = vld [vmem:[%s1459_s1 + $0xc0] sm:$0xff]  ;;  %v65_v8 = vld [vmem:[%s1459_s1 + $0xb8] sm:$0xff] }
   0x4   :  { %120 = vmatprep.subr.mxu0 %v71_v2  ;;  %v64_v9 = vld [vmem:[%s1459_s1 + $0xb0] sm:$0xff]  ;;  %v63_v10 = vld [vmem:[%s1459_s1 + $0xa8] sm:$0xff]  ;;  %v62_v11 = vld [vmem:[%s1459_s1 + $0xa0] sm:$0xff] }
   0x5   :  { %121 = vmatpush1.msra.mxu0 %v70_v3  ;;  %v61_v12 = vld [vmem:[%s1459_s1 + $0x98] sm:$0xff]  ;;  %v60_v13 = vld [vmem:[%s1459_s1 + $0x90] sm:$0xff]  ;;  %v59_v14 = vld [vmem:[%s1459_s1 + $0x88] sm:$0xff] }
   0x6   :  { %122 = vmatprep.subr.mxu0 %v69_v4  ;;  %v58_v15 = vld [vmem:[%s1459_s1 + $0x80] sm:$0xff]  ;;  %v57_v16 = vld [vmem:[%s1459_s1 + $0x78] sm:$0xff]  ;;  %v56_v17 = vld [vmem:[%s1459_s1 + $0x70] sm:$0xff] }
   0x7   :  { %123 = vmatpush1.msra.mxu0 %v68_v5  ;;  %v55_v18 = vld [vmem:[%s1459_s1 + $0x68] sm:$0xff]  ;;  %v54_v19 = vld [vmem:[%s1459_s1 + $0x60] sm:$0xff]  ;;  %v53_v20 = vld [vmem:[%s1459_s1 + $0x58] sm:$0xff] }
   0x8   :  { %124 = vmatprep.subr.mxu0 %v67_v6  ;;  %v52_v21 = vld [vmem:[%s1459_s1 + $0x50] sm:$0xff]  ;;  %v51_v22 = vld [vmem:[%s1459_s1 + $0x48] sm:$0xff]  ;;  %v50_v23 = vld [vmem:[%s1459_s1 + $0x40] sm:$0xff] }
   0x9   :  { %125 = vmatpush1.msra.mxu0 %v66_v7  ;;  %v49_v24 = vld [vmem:[%s1459_s1 + $0x38] sm:$0xff]  ;;  %v41_v25 = vld [vmem:[%s1458_s0 + $0x8] sm:$0xff]  ;;  %v221_v28 = vld [vmem:[%s1461_s3 + $0xf0] sm:$0xff] }
   0xa   :  { %126 = vmatprep.subr.mxu0 %v65_v8  ;;  %182 = vmatprep.mubr.f32.mxu0 %v41_v25  ;;  %v222_v26 = vld [vmem:[%s1461_s3 + $0xf8] sm:$0xff]  ;;  %v48_v29 = vld [vmem:[%s1459_s1 + $0x30] sm:$0xff]  ;;  %v47_v31 = vld [vmem:[%s1459_s1 + $0x28] sm:$0xff] }
   0xb   :  { %127 = vmatpush1.msra.mxu0 %v64_v9  ;;  %v206_v27 = vld [vmem:[%s1461_s3 + $0x78] sm:$0xff]  ;;  %680 = vmatprep.subr.mxu1 %v222_v26  ;;  %v205_v30 = vld [vmem:[%s1461_s3 + $0x70] sm:$0xff]  ;;  %v220_v32 = vld [vmem:[%s1461_s3 + $0xe8] sm:$0xff] }
   0xc   :  { %128 = vmatprep.subr.mxu0 %v63_v10  ;;  %681 = vmatpush3.msra.mxu1 %v206_v27  ;;  %v46_v33 = vld [vmem:[%s1459_s1 + $0x20] sm:$0xff]  ;;  %v204_v34 = vld [vmem:[%s1461_s3 + $0x68] sm:$0xff]  ;;  %v45_v35 = vld [vmem:[%s1459_s1 + $0x18] sm:$0xff] }
   0xd   :  { %129 = vmatpush1.msra.mxu0 %v62_v11  ;;  %682 = vmatprep.subr.mxu1 %v221_v28  ;;  %v219_v36 = vld [vmem:[%s1461_s3 + $0xe0] sm:$0xff]  ;;  %v44_v37 = vld [vmem:[%s1459_s1 + $0x10] sm:$0xff]  ;;  %v43_v39 = vld [vmem:[%s1459_s1 + $0x8] sm:$0xff] }
   0xe   :  { %130 = vmatprep.subr.mxu0 %v61_v12  ;;  %683 = vmatpush3.msra.mxu1 %v205_v30  ;;  %v203_v38 = vld [vmem:[%s1461_s3 + $0x60] sm:$0xff]  ;;  %v218_v40 = vld [vmem:[%s1461_s3 + $0xd8] sm:$0xff]  ;;  %v217_v44 = vld [vmem:[%s1461_s3 + $0xd0] sm:$0xff] }
   0xf   :  { %131 = vmatpush1.msra.mxu0 %v60_v13  ;;  %684 = vmatprep.subr.mxu1 %v220_v32  ;;  %v42_v41 = vld [vmem:[%s1459_s1] sm:$0xff]  ;;  %v202_v42 = vld [vmem:[%s1461_s3 + $0x58] sm:$0xff] }
  0x10   :  { %132 = vmatprep.subr.mxu0 %v59_v14  ;;  %685 = vmatpush3.msra.mxu1 %v204_v34  ;;  %v105_v43 = vld [vmem:[%s1459_s1 + $0x1f8] sm:$0xff] }
  0x11   :  { %133 = vmatpush1.msra.mxu0 %v58_v15  ;;  %686 = vmatprep.subr.mxu1 %v219_v36 }
  0x12   :  { %134 = vmatprep.subr.mxu0 %v57_v16  ;;  %687 = vmatpush3.msra.mxu1 %v203_v38 }
  0x13   :  { %135 = vmatpush1.msra.mxu0 %v56_v17 }
  0x14   :  { %136 = vmatprep.subr.mxu0 %v55_v18 }
  0x15   :  { %137 = vmatpush1.msra.mxu0 %v54_v19 }
  0x16   :  { %138 = vmatprep.subr.mxu0 %v53_v20 }
  0x17   :  { %139 = vmatpush1.msra.mxu0 %v52_v21 }
  0x18   :  { %140 = vmatprep.subr.mxu0 %v51_v22 }
  0x19   :  { %141 = vmatpush1.msra.mxu0 %v50_v23 }
  0x1a   :  { %142 = vmatprep.subr.mxu0 %v49_v24 }
  0x1b   :  { %143 = vmatpush1.msra.mxu0 %v48_v29 }
  0x1c   :  { %144 = vmatprep.subr.mxu0 %v47_v31 }
  0x1d   :  { %145 = vmatpush1.msra.mxu0 %v46_v33 }
  0x1e   :  { %146 = vmatprep.subr.mxu0 %v45_v35 }
  0x1f   :  { %147 = vmatpush1.msra.mxu0 %v44_v37 }
  0x20   :  { %19 = vsyncpa [#allocation5], 0  ;;  %148 = vmatprep.subr.mxu0 %v43_v39  ;;  %v104_v45 = vld [vmem:[%s1459_s1 + $0x1f0] sm:$0xff]  ;;  %688 = vmatprep.subr.mxu1 %v218_v40  ;;  %v103_v47 = vld [vmem:[%s1459_s1 + $0x1e8] sm:$0xff]  ;;  %v108_v34 = vlaneseq  ;;  %vm771_vm0 = vmmov 0   ;;  %vm303_vm1 = vcmask 64512  }
  0x21   :  { %v201_v46 = vld [vmem:[%s1461_s3 + $0x50] sm:$0xff]  ;;  %149 = vmatpush1.msra.mxu0 %v42_v41  ;;  %689 = vmatpush3.msra.mxu1 %v202_v42  ;;  %v216_v48 = vld [vmem:[%s1461_s3 + $0xc8] sm:$0xff]  ;;  %v102_v49 = vld [vmem:[%s1459_s1 + $0x1e0] sm:$0xff]  ;;  %s773_s19 = smov [#allocation4]  }
  0x22   :  { %150 = vmatprep.subr.mxu0 %v105_v43  ;;  %690 = vmatprep.subr.mxu1 %v217_v44  ;;  %v200_v50 = vld [vmem:[%s1461_s3 + $0x48] sm:$0xff]  ;;  %v101_v51 = vld [vmem:[%s1459_s1 + $0x1d8] sm:$0xff]  ;;  %v215_v52 = vld [vmem:[%s1461_s3 + $0xc0] sm:$0xff]  ;;  %v109_v35 = vshrl.u32 %v108_v34, 7  ;;  %s662_s20 = sshll.u32 %s773_s19, 4  ;;  %s663_s20 = int_to_ptr.vmem [resolvable:$true] %s662_s20 }
  0x23   :  { %151 = vmatpush2.msra.mxu0 %v104_v45  ;;  %691 = vmatpush3.msra.mxu1 %v201_v46  ;;  %v100_v53 = vld [vmem:[%s1459_s1 + $0x1d0] sm:$0xff]  ;;  %v199_v54 = vld [vmem:[%s1461_s3 + $0x40] sm:$0xff]  ;;  %v99_v55 = vld [vmem:[%s1459_s1 + $0x1c8] sm:$0xff] }
  0x24   :  { %152 = vmatprep.subr.mxu0 %v103_v47  ;;  %692 = vmatprep.subr.mxu1 %v216_v48  ;;  %v214_v56 = vld [vmem:[%s1461_s3 + $0xb8] sm:$0xff]  ;;  %v98_v57 = vld [vmem:[%s1459_s1 + $0x1c0] sm:$0xff]  ;;  %v213_v60 = vld [vmem:[%s1461_s3 + $0xb0] sm:$0xff]  ;;  %v1133_v36 = vsub.s32 0, %v109_v35  ;;  %v1138_v38 = vsub.s32 1, %v109_v35  ;;  %v770_v47 = vmov 0.0  }
  0x25   :  { %153 = vmatpush2.msra.mxu0 %v102_v49  ;;  %693 = vmatpush3.msra.mxu1 %v200_v50  ;;  %v198_v58 = vld [vmem:[%s1461_s3 + $0x38] sm:$0xff]  ;;  %v96_v61 = vld [vmem:[%s1459_s1 + $0x1b0] sm:$0xff]  ;;  %v95_v63 = vld [vmem:[%s1459_s1 + $0x1a8] sm:$0xff] }
  0x26   :  { %154 = vmatprep.subr.mxu0 %v101_v51  ;;  %694 = vmatprep.subr.mxu1 %v215_v52  ;;  %v97_v59 = vld [vmem:[%s1459_s1 + $0x1b8] sm:$0xff]  ;;  %v197_v62 = vld [vmem:[%s1461_s3 + $0x30] sm:$0xff]  ;;  %v212_v0 = vld [vmem:[%s1461_s3 + $0xa8] sm:$0xff] }
  0x27   :  { %155 = vmatpush2.msra.mxu0 %v100_v53  ;;  %695 = vmatpush3.msra.mxu1 %v199_v54  ;;  %v94_v1 = vld [vmem:[%s1459_s1 + $0x1a0] sm:$0xff]  ;;  %v196_v2 = vld [vmem:[%s1461_s3 + $0x28] sm:$0xff]  ;;  %v93_v3 = vld [vmem:[%s1459_s1 + $0x198] sm:$0xff] }
  0x28   :  { %156 = vmatprep.subr.mxu0 %v99_v55  ;;  %696 = vmatprep.subr.mxu1 %v214_v56  ;;  %v211_v4 = vld [vmem:[%s1461_s3 + $0xa0] sm:$0xff]  ;;  %v92_v5 = vld [vmem:[%s1459_s1 + $0x190] sm:$0xff]  ;;  %v91_v7 = vld [vmem:[%s1459_s1 + $0x188] sm:$0xff] }
  0x29   :  { %157 = vmatpush2.msra.mxu0 %v98_v57  ;;  %697 = vmatpush3.msra.mxu1 %v198_v58  ;;  %v195_v6 = vld [vmem:[%s1461_s3 + $0x20] sm:$0xff]  ;;  %v89_v9 = vld [vmem:[%s1459_s1 + $0x178] sm:$0xff]  ;;  %v88_v10 = vld [vmem:[%s1459_s1 + $0x170] sm:$0xff] }
  0x2a   :  { %158 = vmatprep.subr.mxu0 %v97_v59  ;;  %698 = vmatprep.subr.mxu1 %v213_v60  ;;  %v90_v8 = vld [vmem:[%s1459_s1 + $0x180] sm:$0xff]  ;;  %v87_v11 = vld [vmem:[%s1459_s1 + $0x168] sm:$0xff]  ;;  %v85_v13 = vld [vmem:[%s1459_s1 + $0x158] sm:$0xff] }
  0x2b   :  { %159 = vmatpush2.msra.mxu0 %v96_v61  ;;  %699 = vmatpush3.msra.mxu1 %v197_v62  ;;  %v86_v12 = vld [vmem:[%s1459_s1 + $0x160] sm:$0xff]  ;;  %v84_v14 = vld [vmem:[%s1459_s1 + $0x150] sm:$0xff]  ;;  %v83_v15 = vld [vmem:[%s1459_s1 + $0x148] sm:$0xff] }
  0x2c   :  { %160 = vmatprep.subr.mxu0 %v95_v63  ;;  %700 = vmatprep.subr.mxu1 %v212_v0  ;;  %v82_v16 = vld [vmem:[%s1459_s1 + $0x140] sm:$0xff]  ;;  %v81_v17 = vld [vmem:[%s1459_s1 + $0x138] sm:$0xff]  ;;  %v80_v18 = vld [vmem:[%s1459_s1 + $0x130] sm:$0xff] }
  0x2d   :  { %161 = vmatpush2.msra.mxu0 %v94_v1  ;;  %701 = vmatpush3.msra.mxu1 %v196_v2  ;;  %v79_v19 = vld [vmem:[%s1459_s1 + $0x128] sm:$0xff]  ;;  %v78_v20 = vld [vmem:[%s1459_s1 + $0x120] sm:$0xff]  ;;  %v77_v21 = vld [vmem:[%s1459_s1 + $0x118] sm:$0xff] }
  0x2e   :  { %162 = vmatprep.subr.mxu0 %v93_v3  ;;  %702 = vmatprep.subr.mxu1 %v211_v4  ;;  %v76_v22 = vld [vmem:[%s1459_s1 + $0x110] sm:$0xff]  ;;  %v75_v23 = vld [vmem:[%s1459_s1 + $0x108] sm:$0xff]  ;;  %v74_v24 = vld [vmem:[%s1459_s1 + $0x100] sm:$0xff] }
  0x2f   :  { %163 = vmatpush2.msra.mxu0 %v92_v5  ;;  %703 = vmatpush3.msra.mxu1 %v195_v6  ;;  %v40_v25 = vld [vmem:[%s1458_s0] sm:$0xff]  ;;  %v210_v26 = vld [vmem:[%s1461_s3 + $0x98] sm:$0xff]  ;;  %v209_v28 = vld [vmem:[%s1461_s3 + $0x90] sm:$0xff] }
  0x30   :  { %164 = vmatprep.subr.mxu0 %v91_v7  ;;  %704 = vmatprep.subr.mxu1 %v210_v26  ;;  %v194_v27 = vld [vmem:[%s1461_s3 + $0x18] sm:$0xff]  ;;  %v193_v29 = vld [vmem:[%s1461_s3 + $0x10] sm:$0xff]  ;;  %v208_v30 = vld [vmem:[%s1461_s3 + $0x88] sm:$0xff] }
  0x31   :  { %165 = vmatpush2.msra.mxu0 %v90_v8  ;;  %705 = vmatpush3.msra.mxu1 %v194_v27  ;;  %v192_v31 = vld [vmem:[%s1461_s3 + $0x8] sm:$0xff]  ;;  %v207_v32 = vld [vmem:[%s1461_s3 + $0x80] sm:$0xff]  ;;  %v409_v55 = vld [vmem:[%s1464_s6 + $0xf8] sm:$0xff] }
  0x32   :  { %166 = vmatprep.subr.mxu0 %v89_v9  ;;  %706 = vmatprep.subr.mxu1 %v209_v28  ;;  %v191_v33 = vld [vmem:[%s1461_s3] sm:$0xff]  ;;  %v408_v56 = vld [vmem:[%s1464_s6 + $0xf0] sm:$0xff]  ;;  %v407_v57 = vld [vmem:[%s1464_s6 + $0xe8] sm:$0xff]  ;;  %s772_s3 = smov [#allocation2]  }
  0x33   :  { %167 = vmatpush2.msra.mxu0 %v88_v10  ;;  %707 = vmatpush3.msra.mxu1 %v193_v29  ;;  %v106_v37 = vld [vmem:[%s1460_s2] sm:$0x3]  ;;  %v405_v59 = vld [vmem:[%s1464_s6 + $0xd8] sm:$0xff]  ;;  %v404_v60 = vld [vmem:[%s1464_s6 + $0xd0] sm:$0xff] }
  0x34   :  { %168 = vmatprep.subr.mxu0 %v87_v11  ;;  %708 = vmatprep.subr.mxu1 %v208_v30  ;;  %v111_v39 = vrot.slane %v106_v37, %v1133_v36  ;;  %v115_v40 = vrot.slane %v106_v37, %v1138_v38  ;;  %v678_v49 = vld [vmem:[%s1462_s4] ss:$0 sm:$0xff]  ;;  %v403_v61 = vld [vmem:[%s1464_s6 + $0xc8] sm:$0xff]  ;;  %v401_v63 = vld [vmem:[%s1464_s6 + $0xb8] sm:$0xff] }
  0x35   :  { %169 = vmatpush2.msra.mxu0 %v86_v12  ;;  %709 = vmatpush3.msra.mxu1 %v192_v31  ;;  %v302_v54 = vld [vmem:[%s1463_s5] sm:$0xff]  ;;  %v400_v0 = vld [vmem:[%s1464_s6 + $0xb0] sm:$0xff]  ;;  %v399_v1 = vld [vmem:[%s1464_s6 + $0xa8] sm:$0xff] }
  0x36   :  { %170 = vmatprep.subr.mxu0 %v85_v13  ;;  %710 = vmatprep.subr.mxu1 %v207_v32  ;;  %v406_v58 = vld [vmem:[%s1464_s6 + $0xe0] sm:$0xff]  ;;  %v397_v3 = vld [vmem:[%s1464_s6 + $0x98] sm:$0xff]  ;;  %v396_v4 = vld [vmem:[%s1464_s6 + $0x90] sm:$0xff] }
  0x37   :  { %171 = vmatpush2.msra.mxu0 %v84_v14  ;;  %711 = vmatpush3.msra.mxu1 %v191_v33  ;;  %v402_v62 = vld [vmem:[%s1464_s6 + $0xc0] sm:$0xff]  ;;  %v395_v5 = vld [vmem:[%s1464_s6 + $0x88] sm:$0xff]  ;;  %v393_v7 = vld [vmem:[%s1464_s6 + $0x78] sm:$0xff] }
  0x38   :  { %172 = vmatprep.subr.mxu0 %v83_v15  ;;  %717 = vmatprep.subr.mxu1 %v770_v47  ;;  %v398_v2 = vld [vmem:[%s1464_s6 + $0xa0] sm:$0xff]  ;;  %v392_v8 = vld [vmem:[%s1464_s6 + $0x70] sm:$0xff]  ;;  %v391_v9 = vld [vmem:[%s1464_s6 + $0x68] sm:$0xff] }
  0x39   :  { %173 = vmatpush2.msra.mxu0 %v82_v16  ;;  %v394_v6 = vld [vmem:[%s1464_s6 + $0x80] sm:$0xff]  ;;  %v389_v11 = vld [vmem:[%s1464_s6 + $0x58] sm:$0xff]  ;;  %v388_v12 = vld [vmem:[%s1464_s6 + $0x50] sm:$0xff] }
  0x3a   :  { %174 = vmatprep.subr.mxu0 %v81_v17  ;;  %v390_v10 = vld [vmem:[%s1464_s6 + $0x60] sm:$0xff]  ;;  %v387_v13 = vld [vmem:[%s1464_s6 + $0x48] sm:$0xff]  ;;  %v385_v15 = vld [vmem:[%s1464_s6 + $0x38] sm:$0xff] }
  0x3b   :  { %175 = vmatpush2.msra.mxu0 %v80_v18  ;;  %v386_v14 = vld [vmem:[%s1464_s6 + $0x40] sm:$0xff]  ;;  %v384_v16 = vld [vmem:[%s1464_s6 + $0x30] sm:$0xff]  ;;  %v383_v17 = vld [vmem:[%s1464_s6 + $0x28] sm:$0xff] }
  0x3c   :  { %176 = vmatprep.subr.mxu0 %v79_v19  ;;  %v382_v18 = vld [vmem:[%s1464_s6 + $0x20] sm:$0xff]  ;;  %v381_v19 = vld [vmem:[%s1464_s6 + $0x18] sm:$0xff]  ;;  %v521_v28 = vld [vmem:[%s1466_s8 + $0xd0] sm:$0xff] }
  0x3d   :  { %177 = vmatpush2.msra.mxu0 %v78_v20  ;;  %v380_v20 = vld [vmem:[%s1464_s6 + $0x10] sm:$0xff]  ;;  %v523_v26 = vld [vmem:[%s1466_s8 + $0xe0] sm:$0xff]  ;;  %v522_v27 = vld [vmem:[%s1466_s8 + $0xd8] sm:$0xff] }
  0x3e   :  { %178 = vmatprep.subr.mxu0 %v77_v21  ;;  %v379_v21 = vld [vmem:[%s1464_s6 + $0x8] sm:$0xff]  ;;  %v519_v30 = vld [vmem:[%s1466_s8 + $0xc0] sm:$0xff]  ;;  %v518_v31 = vld [vmem:[%s1466_s8 + $0xb8] sm:$0xff] }
  0x3f   :  { %179 = vmatpush2.msra.mxu0 %v76_v22  ;;  %v378_v22 = vld [vmem:[%s1464_s6] sm:$0xff]  ;;  %v520_v29 = vld [vmem:[%s1466_s8 + $0xc8] sm:$0xff]  ;;  %v517_v32 = vld [vmem:[%s1466_s8 + $0xb0] sm:$0xff] }
  0x40   :  { %180 = vmatprep.subr.mxu0 %v75_v23  ;;  %v526_v23 = vld [vmem:[%s1466_s8 + $0xf8] sm:$0xff]  ;;  %v516_v33 = vld [vmem:[%s1466_s8 + $0xa8] sm:$0xff]  ;;  %v515_v34 = vld [vmem:[%s1466_s8 + $0xa0] sm:$0xff] }
  0x41   :  { %181 = vmatpush2.msra.mxu0 %v74_v24  ;;  %v525_v24 = vld [vmem:[%s1466_s8 + $0xf0] sm:$0xff]  ;;  %v514_v35 = vld [vmem:[%s1466_s8 + $0x98] sm:$0xff] }
  0x42   :  { %183 = vmatmul.mubr.f32.vlgmr.msra.gmra.mxu0 %v40_v25  ;;  %v524_v25 = vld [vmem:[%s1466_s8 + $0xe8] sm:$0xff]  ;;  %571 = vmatprep.subr.mxu0 %v526_v23  ;;  %v513_v37 = vld [vmem:[%s1466_s8 + $0x90] sm:$0xff]  ;;  %v530_v23 = vld [vmem:[%s1466_s8 + $0x118] sm:$0xff] }
  0x43   :  { %572 = vmatpush1.msra.mxu0 %v525_v24  ;;  %v529_v24 = vld [vmem:[%s1466_s8 + $0x110] sm:$0xff] }
  0x44   :  { %573 = vmatprep.subr.mxu0 %v524_v25  ;;  %v528_v25 = vld [vmem:[%s1466_s8 + $0x108] sm:$0xff] }
  0x45   :  { %574 = vmatpush1.msra.mxu0 %v523_v26  ;;  %v527_v26 = vld [vmem:[%s1466_s8 + $0x100] sm:$0xff] }
  0x46   :  { %575 = vmatprep.subr.mxu0 %v522_v27  ;;  %v410_v27 = vld [vmem:[%s1465_s7] sm:$0x3] }
  0x47   :  { %576 = vmatpush1.msra.mxu0 %v521_v28  ;;  %v415_v28 = vrot.slane %v410_v27, %v1133_v36 }
  0x48   :  { %577 = vmatprep.subr.mxu0 %v520_v29  ;;  %v419_v29 = vrot.slane %v410_v27, %v1138_v38 }
  0x49   :  { %578 = vmatpush1.msra.mxu0 %v519_v30 }
  0x4a   :  { %579 = vmatprep.subr.mxu0 %v518_v31 }
  0x4b   :  { %580 = vmatpush1.msra.mxu0 %v517_v32 }
  0x4c   :  { %581 = vmatprep.subr.mxu0 %v516_v33 }
  0x4d   :  { %582 = vmatpush1.msra.mxu0 %v515_v34 }
  0x4e   :  { %583 = vmatprep.subr.mxu0 %v514_v35 }
  0x4f   :  { %584 = vmatpush1.msra.mxu0 %v513_v37 }
 0x102   :  { %v184_v41 = vpop.f32.mrf.mxu0 }
 0x103   :  { %v185_v42 = vadd.f32 %v184_v41, %v111_v39  ;;  %v512_v39 = vld [vmem:[%s1466_s8 + $0x88] sm:$0xff]  ;;  %v510_v41 = vld [vmem:[%s1466_s8 + $0x78] sm:$0xff] }
 0x104   :  { %v186_v43 = vpop.f32.mrf.mxu0  ;;  %585 = vmatprep.subr.mxu0 %v512_v39 }
 0x105   :  { %v187_v44 = vadd.f32 %v186_v43, %v115_v40  ;;  %v189_v46 = vmax.f32 %v185_v42, 0.0  ;;  %v511_v40 = vld [vmem:[%s1466_s8 + $0x80] sm:$0xff]  ;;  %v509_v42 = vld [vmem:[%s1466_s8 + $0x70] sm:$0xff]  ;;  %v508_v43 = vld [vmem:[%s1466_s8 + $0x68] sm:$0xff] }
 0x106   :  { %586 = vmatpush1.msra.mxu0 %v511_v40 }
 0x107   :  { %v190_v45 = vmax.f32 %v187_v44, 0.0  ;;  %587 = vmatprep.subr.mxu0 %v510_v41  ;;  %v507_v44 = vld [vmem:[%s1466_s8 + $0x60] sm:$0xff] }
 0x108   :  { %588 = vmatpush1.msra.mxu0 %v509_v42 }
 0x109   :  { %294 = vmatprep.mubr.f32.mxu1 %v190_v45  ;;  %v506_v45 = vld [vmem:[%s1466_s8 + $0x58] sm:$0xff]  ;;  %589 = vmatprep.subr.mxu0 %v508_v43 }
 0x10a   :  { %295 = vmatmul.mubr.f32.vlgmr.msra.gmra.mxu1 %v189_v46  ;;  %v505_v46 = vld [vmem:[%s1466_s8 + $0x50] sm:$0xff]  ;;  %590 = vmatpush1.msra.mxu0 %v507_v44 }
 0x10b   :  { %719 = vmatprep.mubr.msk.f32.mxu1 %vm771_vm0, %v770_v47  ;;  %591 = vmatprep.subr.mxu0 %v506_v45 }
 0x10c   :  { %592 = vmatpush1.msra.mxu0 %v505_v46 }
 0x1ca   :  { %v712_v48 = vpop.f32.mrf.mxu1 }
 0x1cc   :  { %v713_v50 = vpop.f32.mrf.mxu1 }
 0x1cd   :  { %v714_v51 = vadd.f32 %v713_v50, %v712_v48  ;;  %v503_v48 = vld [vmem:[%s1466_s8 + $0x40] sm:$0xff]  ;;  %v501_v50 = vld [vmem:[%s1466_s8 + $0x30] sm:$0xff] }
 0x1cf   :  { %v297_v52 = vadd.f32 %v714_v51, %v678_v49  ;;  %v502_v49 = vld [vmem:[%s1466_s8 + $0x38] sm:$0xff]  ;;  %v500_v51 = vld [vmem:[%s1466_s8 + $0x28] sm:$0xff] }
 0x1d1   :  { %v300_v53 = vmax.f32 %v297_v52, 0.0  ;;  %v499_v52 = vld [vmem:[%s1466_s8 + $0x20] sm:$0xff] }
 0x1d3   :  { %301 = vst [vmem:[#allocation2] sm:$0xff] %v300_v53  ;;  %718 = vmatpush3.msra.mxu1 %v300_v53  ;;  %v498_v53 = vld [vmem:[%s1466_s8 + $0x18] sm:$0xff] }
 0x1d4   :  { %720 = vmatmul.mubr.msk.f32.vlgmr.msra.gmra.mxu1 %vm303_vm1, %v302_v54  ;;  %422 = vmatprep.subr.mxu1 %v409_v55  ;;  %v497_v54 = vld [vmem:[%s1466_s8 + $0x10] sm:$0xff]  ;;  %v496_v55 = vld [vmem:[%s1466_s8 + $0x8] sm:$0xff] }
 0x1d5   :  { %423 = vmatpush1.msra.mxu1 %v408_v56  ;;  %486 = vmatprep.mubr.f32.mxu1 %v770_v47  ;;  %v504_v47 = vld [vmem:[%s1466_s8 + $0x48] sm:$0xff]  ;;  %v495_v56 = vld [vmem:[%s1466_s8] sm:$0xff] }
 0x1d6   :  { %424 = vmatprep.subr.mxu1 %v407_v57  ;;  %593 = vmatprep.subr.mxu0 %v504_v47  ;;  %v558_v57 = vld [vmem:[%s1466_s8 + $0x1f8] sm:$0xff] }
 0x1d7   :  { %425 = vmatpush1.msra.mxu1 %v406_v58  ;;  %594 = vmatpush1.msra.mxu0 %v503_v48  ;;  %v557_v58 = vld [vmem:[%s1466_s8 + $0x1f0] sm:$0xff] }
 0x1d8   :  { %426 = vmatprep.subr.mxu1 %v405_v59  ;;  %595 = vmatprep.subr.mxu0 %v502_v49  ;;  %v556_v59 = vld [vmem:[%s1466_s8 + $0x1e8] sm:$0xff] }
 0x1d9   :  { %427 = vmatpush1.msra.mxu1 %v404_v60  ;;  %596 = vmatpush1.msra.mxu0 %v501_v50  ;;  %v555_v60 = vld [vmem:[%s1466_s8 + $0x1e0] sm:$0xff] }
 0x1da   :  { %428 = vmatprep.subr.mxu1 %v403_v61  ;;  %597 = vmatprep.subr.mxu0 %v500_v51  ;;  %v554_v61 = vld [vmem:[%s1466_s8 + $0x1d8] sm:$0xff] }
 0x1db   :  { %429 = vmatpush1.msra.mxu1 %v402_v62  ;;  %598 = vmatpush1.msra.mxu0 %v499_v52  ;;  %v553_v62 = vld [vmem:[%s1466_s8 + $0x1d0] sm:$0xff] }
 0x1dc   :  { %430 = vmatprep.subr.mxu1 %v401_v63  ;;  %599 = vmatprep.subr.mxu0 %v498_v53  ;;  %v552_v63 = vld [vmem:[%s1466_s8 + $0x1c8] sm:$0xff] }
 0x1dd   :  { %431 = vmatpush1.msra.mxu1 %v400_v0  ;;  %600 = vmatpush1.msra.mxu0 %v497_v54  ;;  %v551_v0 = vld [vmem:[%s1466_s8 + $0x1c0] sm:$0xff] }
 0x1de   :  { %432 = vmatprep.subr.mxu1 %v399_v1  ;;  %601 = vmatprep.subr.mxu0 %v496_v55  ;;  %v550_v1 = vld [vmem:[%s1466_s8 + $0x1b8] sm:$0xff] }
 0x1df   :  { %433 = vmatpush1.msra.mxu1 %v398_v2  ;;  %602 = vmatpush1.msra.mxu0 %v495_v56  ;;  %v549_v2 = vld [vmem:[%s1466_s8 + $0x1b0] sm:$0xff] }
 0x1e0   :  { %434 = vmatprep.subr.mxu1 %v397_v3  ;;  %603 = vmatprep.subr.mxu0 %v558_v57  ;;  %v548_v3 = vld [vmem:[%s1466_s8 + $0x1a8] sm:$0xff] }
 0x1e1   :  { %435 = vmatpush1.msra.mxu1 %v396_v4  ;;  %604 = vmatpush2.msra.mxu0 %v557_v58  ;;  %v547_v4 = vld [vmem:[%s1466_s8 + $0x1a0] sm:$0xff] }
 0x1e2   :  { %436 = vmatprep.subr.mxu1 %v395_v5  ;;  %605 = vmatprep.subr.mxu0 %v556_v59  ;;  %v546_v5 = vld [vmem:[%s1466_s8 + $0x198] sm:$0xff] }
 0x1e3   :  { %437 = vmatpush1.msra.mxu1 %v394_v6  ;;  %606 = vmatpush2.msra.mxu0 %v555_v60  ;;  %v545_v6 = vld [vmem:[%s1466_s8 + $0x190] sm:$0xff] }
 0x1e4   :  { %438 = vmatprep.subr.mxu1 %v393_v7  ;;  %607 = vmatprep.subr.mxu0 %v554_v61  ;;  %v544_v7 = vld [vmem:[%s1466_s8 + $0x188] sm:$0xff] }
 0x1e5   :  { %439 = vmatpush1.msra.mxu1 %v392_v8  ;;  %608 = vmatpush2.msra.mxu0 %v553_v62  ;;  %v543_v8 = vld [vmem:[%s1466_s8 + $0x180] sm:$0xff] }
 0x1e6   :  { %440 = vmatprep.subr.mxu1 %v391_v9  ;;  %609 = vmatprep.subr.mxu0 %v552_v63  ;;  %v542_v9 = vld [vmem:[%s1466_s8 + $0x178] sm:$0xff] }
 0x1e7   :  { %441 = vmatpush1.msra.mxu1 %v390_v10  ;;  %610 = vmatpush2.msra.mxu0 %v551_v0  ;;  %v541_v10 = vld [vmem:[%s1466_s8 + $0x170] sm:$0xff] }
 0x1e8   :  { %442 = vmatprep.subr.mxu1 %v389_v11  ;;  %611 = vmatprep.subr.mxu0 %v550_v1  ;;  %v540_v11 = vld [vmem:[%s1466_s8 + $0x168] sm:$0xff] }
 0x1e9   :  { %443 = vmatpush1.msra.mxu1 %v388_v12  ;;  %612 = vmatpush2.msra.mxu0 %v549_v2  ;;  %v539_v12 = vld [vmem:[%s1466_s8 + $0x160] sm:$0xff] }
 0x1ea   :  { %444 = vmatprep.subr.mxu1 %v387_v13  ;;  %613 = vmatprep.subr.mxu0 %v548_v3  ;;  %v538_v13 = vld [vmem:[%s1466_s8 + $0x158] sm:$0xff] }
 0x1eb   :  { %445 = vmatpush1.msra.mxu1 %v386_v14  ;;  %614 = vmatpush2.msra.mxu0 %v547_v4  ;;  %v537_v14 = vld [vmem:[%s1466_s8 + $0x150] sm:$0xff] }
 0x1ec   :  { %446 = vmatprep.subr.mxu1 %v385_v15  ;;  %615 = vmatprep.subr.mxu0 %v546_v5  ;;  %v536_v15 = vld [vmem:[%s1466_s8 + $0x148] sm:$0xff] }
 0x1ed   :  { %447 = vmatpush1.msra.mxu1 %v384_v16  ;;  %616 = vmatpush2.msra.mxu0 %v545_v6  ;;  %v535_v16 = vld [vmem:[%s1466_s8 + $0x140] sm:$0xff] }
 0x1ee   :  { %448 = vmatprep.subr.mxu1 %v383_v17  ;;  %617 = vmatprep.subr.mxu0 %v544_v7 }
 0x1ef   :  { %449 = vmatpush1.msra.mxu1 %v382_v18  ;;  %618 = vmatpush2.msra.mxu0 %v543_v8 }
 0x1f0   :  { %450 = vmatprep.subr.mxu1 %v381_v19  ;;  %619 = vmatprep.subr.mxu0 %v542_v9  ;;  %v534_v19 = vld [vmem:[%s1466_s8 + $0x138] sm:$0xff] }
 0x1f1   :  { %451 = vmatpush1.msra.mxu1 %v380_v20  ;;  %620 = vmatpush2.msra.mxu0 %v541_v10  ;;  %v533_v20 = vld [vmem:[%s1466_s8 + $0x130] sm:$0xff] }
 0x1f2   :  { %452 = vmatprep.subr.mxu1 %v379_v21  ;;  %621 = vmatprep.subr.mxu0 %v540_v11  ;;  %v532_v21 = vld [vmem:[%s1466_s8 + $0x128] sm:$0xff] }
 0x1f3   :  { %453 = vmatpush1.msra.mxu1 %v378_v22  ;;  %622 = vmatpush2.msra.mxu0 %v539_v12  ;;  %v531_v22 = vld [vmem:[%s1466_s8 + $0x120] sm:$0xff]  ;;  %s652_s8 = sshll.u32 %s772_s3, 4  ;;  %s653_s8 = int_to_ptr.vmem [resolvable:$true] %s652_s8 }
 0x1f4   :  { %623 = vmatprep.subr.mxu0 %v538_v13  ;;  %s726_s6 = scalar_lea.vmem %s653_s8, 128  ;;  %p731_p1 = scmp.lt.s32.totalorder %s653_s8, %s653_s8 }
 0x1f5   :  { %624 = vmatpush2.msra.mxu0 %v537_v14  ;;  %p727_p0 = scmp.ne.s32.totalorder %s653_s8, %s726_s6  ;;  %p732_p2 = scmp.lt.s32.totalorder %s726_s6, %s726_s6 }
 0x1f6   :  { %625 = vmatprep.subr.mxu0 %v536_v15 }
 0x1f7   :  { %626 = vmatpush2.msra.mxu0 %v535_v16  ;;  %p733_p3 = por %p732_p2, %p731_p1 }
 0x1f8   :  { %627 = vmatprep.subr.mxu0 %v534_v19 }
 0x1f9   :  { %628 = vmatpush2.msra.mxu0 %v533_v20  ;;  %p734_p4 = pnand %p733_p3, %p727_p0 }
 0x1fa   :  { %629 = vmatprep.subr.mxu0 %v532_v21 }
 0x1fb   :  { %630 = vmatpush2.msra.mxu0 %v531_v22 }
 0x1fc   :  { %631 = vmatprep.subr.mxu0 %v530_v23 }
 0x1fd   :  { %632 = vmatpush2.msra.mxu0 %v529_v24 }
 0x1fe   :  { %633 = vmatprep.subr.mxu0 %v528_v25 }
 0x1ff   :  { %634 = vmatpush2.msra.mxu0 %v527_v26 }
 0x294   :  { %v373_v17 = vpop.f32.mrf.mxu1 }
 0x295   :  { %377 = vst [vmem:[#allocation4] sm:$0xff] %v373_v17  ;;  %487 = vmatmul.mubr.f32.vlgmr.msra.gmra.mxu1 %v373_v17 }
 0x296   :  { %v721_v18 = vpop.f32.mrf.mxu1 }
 0x355   :  { %v488_v30 = vpop.f32.mrf.mxu1 }
 0x356   :  { %v489_v31 = vadd.f32 %v488_v30, %v415_v28 }
 0x357   :  { %v490_v32 = vpop.f32.mrf.mxu1 }
 0x358   :  { %v491_v33 = vadd.f32 %v490_v32, %v419_v29  ;;  %v493_v35 = vmax.f32 %v489_v31, 0.0 }
 0x35a   :  { %v494_v34 = vmax.f32 %v491_v33, 0.0 }
 0x35c   :  { %635 = vmatprep.mubr.f32.mxu0 %v494_v34 }
 0x35d   :  { %636 = vmatmul.mubr.f32.vlgmr.msra.gmra.mxu0 %v493_v35 }
 0x35e   :  { %737 = shalt.err (!%p734_p4)
}
 0x35f   :  { %655 = dma.vmem_to_hbm [thread:$0]  %s653_s8, 128, %s1468_s10, [#allocation3]  }
 0x360   :  { %s746_s22 = scalar_lea.vmem %s663_s20, 128  ;;  %p751_p6 = scmp.lt.s32.totalorder %s663_s20, %s663_s20 }
 0x361   :  { %p747_p5 = scmp.ne.s32.totalorder %s663_s20, %s746_s22  ;;  %p752_p7 = scmp.lt.s32.totalorder %s746_s22, %s746_s22 }
 0x363   :  { %p753_p8 = por %p752_p7, %p751_p6 }
 0x365   :  { %p754_p9 = pnand %p753_p8, %p747_p5 }
 0x367   :  { %757 = shalt.err (!%p754_p9)
}
 0x368   :  { %665 = dma.vmem_to_hbm [thread:$0]  %s663_s20, 128, %s1469_s11, [#allocation5]   ;;  %v559_v37 = vld [vmem:[%s1467_s9] sm:$0x3] }
 0x369   :  { %v564_v39 = vrot.slane %v559_v37, %v1133_v36  ;;  %v568_v40 = vrot.slane %v559_v37, %v1138_v38 }
 0x41d   :  { %v637_v41 = vpop.f32.mrf.mxu0 }
 0x41e   :  { %v638_v42 = vadd.f32 %v637_v41, %v564_v39 }
 0x41f   :  { %v639_v43 = vpop.f32.mrf.mxu0 }
 0x420   :  { %v642_v44 = vmax.f32 %v638_v42, 0.0  ;;  %v640_v45 = vadd.f32 %v639_v43, %v568_v40 }
 0x422   :  { %644 = vst [vmem:[%s1470_s12] sm:$0xff] %v642_v44  ;;  %v643_v46 = vmax.f32 %v640_v45, 0.0 }
 0x424   :  { %645 = vst [vmem:[%s1470_s12 + $0x8] sm:$0xff] %v643_v46 }
 0x425   :  { %766 = dma.done.wait [#allocation3], 128  }
 0x426   :  { %767 = vsyncadd [#allocation3], 4294967168 }
 0x427   :  { %768 = dma.done.wait [#allocation5], 128  }
 0x428   :  { %769 = vsyncadd [#allocation5], 4294967168 }
 0x429   :  { %676 = vsyncpa [#allocation3], 1 }
 0x42a   :  { %677 = vsyncpa [#allocation5], 1 }

</bundles_post_ra>
